<compile_context>
chip_gen: v5e
topology: v5e:2x2
jax: 0.10.0
libtpu: 0.0.40
codegen_flags: <defaults>
</compile_context>

<pallas_src>
import jax
import jax.numpy as jnp
from jax.experimental import pallas as pl
from jax.experimental.pallas import tpu as pltpu

# Bayesian network nodes: pt, ts, bp, E, td, tde, C, V, T  -> 9 nodes
STATE_SIZE = 9
ACTION_SIZE = 2
HIDDEN = 128


def _round_up(n, m):
    return ((n + m - 1) // m) * m


def qnet_kernel(x_ref, w1_ref, b1_ref, w2_ref, b2_ref, w3_ref, b3_ref,
                q_ref, act_ref):
    # fc1 + relu (weights stored bf16, cast to f32; bias-add/ReLU kept in f32 so
    # v5e's VPU (no bf16) is happy; MXU accumulates in f32).
    x = x_ref[...]
    h1 = jnp.dot(x, w1_ref[...].astype(jnp.float32),
                 preferred_element_type=jnp.float32)
    h1 = jnp.maximum(h1 + b1_ref[...], 0.0)
    # fc2 + relu
    h2 = jnp.dot(h1, w2_ref[...].astype(jnp.float32),
                 preferred_element_type=jnp.float32)
    h2 = jnp.maximum(h2 + b2_ref[...], 0.0)
    # fc3 (no activation)
    q = jnp.dot(h2, w3_ref[...].astype(jnp.float32),
                preferred_element_type=jnp.float32) + b3_ref[...]
    q_ref[...] = q.astype(q_ref.dtype)
    # Fused DQN greedy action: argmax over the 2 Q-values (ties -> action 0,
    # matching argmax's first-occurrence tie-break).
    act_ref[...] = (q[:, 1:2] > q[:, 0:1]).astype(jnp.int32)


def qnetwork_forward(x, params, *, tb=512):
    """x: [B, STATE_SIZE] float32.

    params: dict with w1/w2/w3 (bf16 or f32, [in, out]) and b1/b2/b3 (f32, [1, out]).
    Returns (q_values [B, ACTION_SIZE] f32, greedy_action [B] int32).
    """
    w1, b1, w2, b2, w3, b3 = (params["w1"], params["b1"], params["w2"],
                              params["b2"], params["w3"], params["b3"])
    B = x.shape[0]

    # Batch tile: multiple of 8 (sublane), capped so per-step VMEM stays small
    # even on v7x's 64 MiB VMEM (TB=512 is already on the roofline plateau).
    tb = max(8, (int(tb) // 8) * 8)
    TB = min(tb, _round_up(B, 8))
    Bp = _round_up(B, TB)
    if Bp != B:
        x = jnp.pad(x, ((0, Bp - B), (0, 0)))  # padded rows sliced away below
    n_tiles = Bp // TB

    tile_map = lambda i: (i, 0)          # x / outputs: new block per grid step
    const_map = lambda i: (0, 0)         # weights/biases: constant block index ->
    full_const = lambda a: pl.BlockSpec(a.shape, const_map)  # never re-DMA'd

    nbytes = lambda a: a.size * a.dtype.itemsize
    weight_bytes = sum(nbytes(a) for a in (w1, b1, w2, b2, w3, b3))
    flops = 2 * Bp * (STATE_SIZE * HIDDEN + HIDDEN * HIDDEN + HIDDEN * ACTION_SIZE)
    bytes_accessed = weight_bytes + Bp * (STATE_SIZE * 4 + ACTION_SIZE * 4 + 4)

    q, act = pl.pallas_call(
        qnet_kernel,
        out_shape=(
            jax.ShapeDtypeStruct((Bp, ACTION_SIZE), jnp.float32),
            jax.ShapeDtypeStruct((Bp, 1), jnp.int32),
        ),
        grid_spec=pltpu.PrefetchScalarGridSpec(
            num_scalar_prefetch=0,
            grid=(n_tiles,),
            in_specs=[
                pl.BlockSpec((TB, STATE_SIZE), tile_map),
                full_const(w1), full_const(b1),
                full_const(w2), full_const(b2),
                full_const(w3), full_const(b3),
            ],
            out_specs=(
                pl.BlockSpec((TB, ACTION_SIZE), tile_map),
                pl.BlockSpec((TB, 1), tile_map),
            ),
        ),
        compiler_params=pltpu.CompilerParams(
            dimension_semantics=("parallel",)),  # shard batch tiles across v7x's 2 TCs
        cost_estimate=pl.CostEstimate(
            flops=flops, transcendentals=0, bytes_accessed=bytes_accessed),
    )(x, w1, b1, w2, b2, w3, b3)

    return q[:B], act[:B, 0]


def init_params(key):
    """PyTorch nn.Linear-style init (U[-1/sqrt(fan_in), 1/sqrt(fan_in)]).

    Weights stored as bf16 (halves HBM->VMEM traffic; MXU-native input dtype on
    v5e/v6e/v7x); biases kept f32, accumulation is f32 in the kernel.
    """
    ks = jax.random.split(key, 6)

    def linear(kw, kb, fan_in, fan_out):
        bound = 1.0 / jnp.sqrt(jnp.float32(fan_in))
        w = jax.random.uniform(kw, (fan_in, fan_out), jnp.float32, -bound, bound)
        b = jax.random.uniform(kb, (1, fan_out), jnp.float32, -bound, bound)
        return w.astype(jnp.bfloat16), b

    w1, b1 = linear(ks[0], ks[1], STATE_SIZE, HIDDEN)
    w2, b2 = linear(ks[2], ks[3], HIDDEN, HIDDEN)
    w3, b3 = linear(ks[4], ks[5], HIDDEN, ACTION_SIZE)
    return {"w1": w1, "b1": b1, "w2": w2, "b2": b2, "w3": w3, "b3": b3}


def reference_forward(x, p):
    h1 = jnp.maximum(x @ p["w1"].astype(jnp.float32) + p["b1"], 0.0)
    h2 = jnp.maximum(h1 @ p["w2"].astype(jnp.float32) + p["b2"], 0.0)
    return h2 @ p["w3"].astype(jnp.float32) + p["b3"]


if __name__ == "__main__":
    key = jax.random.PRNGKey(0)
    k_params, k_x1, k_x2 = jax.random.split(key, 3)
    params = init_params(k_params)

    # Case 1: small inference-sized batch (single tile).
    batch = 8
    x = jax.random.bernoulli(k_x1, 0.5, (batch, STATE_SIZE)).astype(jnp.float32)
    q, act = jax.block_until_ready(qnetwork_forward(x, params))
    ref_q = reference_forward(x, params)
    assert q.shape == (batch, ACTION_SIZE)
    assert act.shape == (batch,)
    assert jnp.allclose(q, ref_q, atol=1e-4, rtol=1e-4)
    assert jnp.array_equal(act, jnp.argmax(q, axis=-1).astype(jnp.int32))

    # Case 2: ragged batch with a small tile -> exercises the pipelined multi-step
    # grid and the batch-padding remainder path.
    batch2 = 37
    x2 = jax.random.bernoulli(k_x2, 0.5, (batch2, STATE_SIZE)).astype(jnp.float32)
    q2, act2 = jax.block_until_ready(qnetwork_forward(x2, params, tb=16))
    ref_q2 = reference_forward(x2, params)
    assert q2.shape == (batch2, ACTION_SIZE)
    assert act2.shape == (batch2,)
    assert jnp.allclose(q2, ref_q2, atol=1e-4, rtol=1e-4)
    assert jnp.array_equal(act2, jnp.argmax(q2, axis=-1).astype(jnp.int32))

    print("KERNEL_OK")
</pallas_src>

<mosaic_0001>
module attributes {stable_mosaic.version = 11 : i64} {
  func.func @qnet_kernel(%arg0: i32, %arg1: memref<8x9xf32, #tpu.memory_space<vmem>>, %arg2: memref<9x128xbf16, #tpu.memory_space<vmem>>, %arg3: memref<1x128xf32, #tpu.memory_space<vmem>>, %arg4: memref<128x128xbf16, #tpu.memory_space<vmem>>, %arg5: memref<1x128xf32, #tpu.memory_space<vmem>>, %arg6: memref<128x2xbf16, #tpu.memory_space<vmem>>, %arg7: memref<1x2xf32, #tpu.memory_space<vmem>>, %arg8: memref<8x2xf32, #tpu.memory_space<vmem>>, %arg9: memref<8x1xi32, #tpu.memory_space<vmem>>) attributes {dimension_semantics = [#tpu.dimension_semantics<parallel>], iteration_bounds = array<i64: 1>, scalar_prefetch = 0 : i64, scratch_operands = 0 : i64, tpu.core_type = #tpu.core_type<tc>, window_params = [{transform_indices = @transform_0, window_bounds = array<i64: 8, 9>}, {pipeline_mode = #tpu.pipeline_mode<synchronous>, transform_indices = @transform_1, window_bounds = array<i64: 9, 128>}, {pipeline_mode = #tpu.pipeline_mode<synchronous>, transform_indices = @transform_2, window_bounds = array<i64: 1, 128>}, {pipeline_mode = #tpu.pipeline_mode<synchronous>, transform_indices = @transform_3, window_bounds = array<i64: 128, 128>}, {pipeline_mode = #tpu.pipeline_mode<synchronous>, transform_indices = @transform_4, window_bounds = array<i64: 1, 128>}, {pipeline_mode = #tpu.pipeline_mode<synchronous>, transform_indices = @transform_5, window_bounds = array<i64: 128, 2>}, {pipeline_mode = #tpu.pipeline_mode<synchronous>, transform_indices = @transform_6, window_bounds = array<i64: 1, 2>}, {transform_indices = @transform_7, window_bounds = array<i64: 8, 2>}, {transform_indices = @transform_8, window_bounds = array<i64: 8, 1>}]} {
    %c0 = arith.constant 0 : index
    %c0_0 = arith.constant 0 : index
    %0 = vector.load %arg1[%c0, %c0_0] : memref<8x9xf32, #tpu.memory_space<vmem>>, vector<8x9xf32>
    %c0_1 = arith.constant 0 : index
    %c0_2 = arith.constant 0 : index
    %1 = vector.load %arg2[%c0_1, %c0_2] : memref<9x128xbf16, #tpu.memory_space<vmem>>, vector<9x128xbf16>
    %2 = arith.extf %1 : vector<9x128xbf16> to vector<9x128xf32>
    %cst = arith.constant dense<0.000000e+00> : vector<8x128xf32>
    %3 = tpu.matmul %0, %2, %cst {dimension_numbers = #tpu.dot_dimension_numbers<[1], [0], [0], [1], [0, 0, 1, 1], [], []>} : vector<8x9xf32>, vector<9x128xf32>, vector<8x128xf32> -> vector<8x128xf32>
    %c0_3 = arith.constant 0 : index
    %c0_4 = arith.constant 0 : index
    %4 = vector.load %arg3[%c0_3, %c0_4] : memref<1x128xf32, #tpu.memory_space<vmem>>, vector<1x128xf32>
    %5 = vector.broadcast %4 : vector<1x128xf32> to vector<8x128xf32>
    %6 = arith.addf %3, %5 : vector<8x128xf32>
    %cst_5 = arith.constant 0.000000e+00 : f32
    %7 = vector.broadcast %cst_5 : f32 to vector<8x128xf32>
    %8 = arith.maximumf %6, %7 : vector<8x128xf32>
    %c0_6 = arith.constant 0 : index
    %c0_7 = arith.constant 0 : index
    %9 = vector.load %arg4[%c0_6, %c0_7] : memref<128x128xbf16, #tpu.memory_space<vmem>>, vector<128x128xbf16>
    %10 = arith.extf %9 : vector<128x128xbf16> to vector<128x128xf32>
    %cst_8 = arith.constant dense<0.000000e+00> : vector<8x128xf32>
    %11 = tpu.matmul %8, %10, %cst_8 {dimension_numbers = #tpu.dot_dimension_numbers<[1], [0], [0], [1], [0, 0, 1, 1], [], []>} : vector<8x128xf32>, vector<128x128xf32>, vector<8x128xf32> -> vector<8x128xf32>
    %c0_9 = arith.constant 0 : index
    %c0_10 = arith.constant 0 : index
    %12 = vector.load %arg5[%c0_9, %c0_10] : memref<1x128xf32, #tpu.memory_space<vmem>>, vector<1x128xf32>
    %13 = vector.broadcast %12 : vector<1x128xf32> to vector<8x128xf32>
    %14 = arith.addf %11, %13 : vector<8x128xf32>
    %cst_11 = arith.constant 0.000000e+00 : f32
    %15 = vector.broadcast %cst_11 : f32 to vector<8x128xf32>
    %16 = arith.maximumf %14, %15 : vector<8x128xf32>
    %c0_12 = arith.constant 0 : index
    %c0_13 = arith.constant 0 : index
    %17 = vector.load %arg6[%c0_12, %c0_13] : memref<128x2xbf16, #tpu.memory_space<vmem>>, vector<128x2xbf16>
    %18 = arith.extf %17 : vector<128x2xbf16> to vector<128x2xf32>
    %cst_14 = arith.constant dense<0.000000e+00> : vector<8x2xf32>
    %19 = tpu.matmul %16, %18, %cst_14 {dimension_numbers = #tpu.dot_dimension_numbers<[1], [0], [0], [1], [0, 0, 1, 1], [], []>} : vector<8x128xf32>, vector<128x2xf32>, vector<8x2xf32> -> vector<8x2xf32>
    %c0_15 = arith.constant 0 : index
    %c0_16 = arith.constant 0 : index
    %20 = vector.load %arg7[%c0_15, %c0_16] : memref<1x2xf32, #tpu.memory_space<vmem>>, vector<1x2xf32>
    %21 = vector.broadcast %20 : vector<1x2xf32> to vector<8x2xf32>
    %22 = arith.addf %19, %21 : vector<8x2xf32>
    %c0_17 = arith.constant 0 : index
    %c0_18 = arith.constant 0 : index
    %23 = vector.load %arg8[%c0_17, %c0_18] : memref<8x2xf32, #tpu.memory_space<vmem>>, vector<8x2xf32>
    tpu.vector_store %arg8[%c0_17, %c0_18], %22 {strides = array<i32>} : memref<8x2xf32, #tpu.memory_space<vmem>>, vector<8x2xf32>,
    %24 = vector.extract_strided_slice %22 {offsets = [0, 1], sizes = [8, 1], strides = [1, 1]} : vector<8x2xf32> to vector<8x1xf32>
    %25 = vector.extract_strided_slice %22 {offsets = [0, 0], sizes = [8, 1], strides = [1, 1]} : vector<8x2xf32> to vector<8x1xf32>
    %26 = arith.cmpf ogt, %24, %25 : vector<8x1xf32>
    %27 = arith.extui %26 : vector<8x1xi1> to vector<8x1xi32>
    %c0_19 = arith.constant 0 : index
    %c0_20 = arith.constant 0 : index
    %28 = vector.load %arg9[%c0_19, %c0_20] : memref<8x1xi32, #tpu.memory_space<vmem>>, vector<8x1xi32>
    tpu.vector_store %arg9[%c0_19, %c0_20], %27 {strides = array<i32>} : memref<8x1xi32, #tpu.memory_space<vmem>>, vector<8x1xi32>,
    return
  }
  func.func @transform_0(%arg0: i32) -> (i32, i32) {
    %c0_i32 = arith.constant 0 : i32
    %c0_i32_0 = arith.constant 0 : i32
    return %arg0, %c0_i32 : i32, i32
  }
  func.func @transform_1(%arg0: i32) -> (i32, i32) {
    %c0_i32 = arith.constant 0 : i32
    %c0_i32_0 = arith.constant 0 : i32
    %c0_i32_1 = arith.constant 0 : i32
    return %c0_i32, %c0_i32_0 : i32, i32
  }
  func.func @transform_2(%arg0: i32) -> (i32, i32) {
    %c0_i32 = arith.constant 0 : i32
    %c0_i32_0 = arith.constant 0 : i32
    %c0_i32_1 = arith.constant 0 : i32
    return %c0_i32, %c0_i32_0 : i32, i32
  }
  func.func @transform_3(%arg0: i32) -> (i32, i32) {
    %c0_i32 = arith.constant 0 : i32
    %c0_i32_0 = arith.constant 0 : i32
    %c0_i32_1 = arith.constant 0 : i32
    return %c0_i32, %c0_i32_0 : i32, i32
  }
  func.func @transform_4(%arg0: i32) -> (i32, i32) {
    %c0_i32 = arith.constant 0 : i32
    %c0_i32_0 = arith.constant 0 : i32
    %c0_i32_1 = arith.constant 0 : i32
    return %c0_i32, %c0_i32_0 : i32, i32
  }
  func.func @transform_5(%arg0: i32) -> (i32, i32) {
    %c0_i32 = arith.constant 0 : i32
    %c0_i32_0 = arith.constant 0 : i32
    %c0_i32_1 = arith.constant 0 : i32
    return %c0_i32, %c0_i32_0 : i32, i32
  }
  func.func @transform_6(%arg0: i32) -> (i32, i32) {
    %c0_i32 = arith.constant 0 : i32
    %c0_i32_0 = arith.constant 0 : i32
    %c0_i32_1 = arith.constant 0 : i32
    return %c0_i32, %c0_i32_0 : i32, i32
  }
  func.func @transform_7(%arg0: i32) -> (i32, i32) {
    %c0_i32 = arith.constant 0 : i32
    %c0_i32_0 = arith.constant 0 : i32
    return %arg0, %c0_i32 : i32, i32
  }
  func.func @transform_8(%arg0: i32) -> (i32, i32) {
    %c0_i32 = arith.constant 0 : i32
    %c0_i32_0 = arith.constant 0 : i32
    return %arg0, %c0_i32 : i32, i32
  }
}

</mosaic_0001>

<bundles_post_ra>
// kernel: tpu_custom_call.1
= control target key start
LH: loop header
LB: loop body
LE: loop exit
PB: predicated region body
PF: predicated region fallthrough
CT: control target
= control target key end

     0   :  { %14 = vsyncpa [#allocation3], 0  ;;  %s494_s0 = inlined_call_operand.hbm [shape: f32[8,9], index: 0, kind: input, shape index: {}]   ;;  %s495_s1 = inlined_call_operand.hbm [shape: bf16[9,128], index: 1, kind: input, shape index: {}]   ;;  %s496_s2 = inlined_call_operand.vmem [shape: f32[1,128], index: 2, kind: input, shape index: {}]   ;;  %s497_s3 = inlined_call_operand.vmem [shape: bf16[128,128], index: 3, kind: input, shape index: {}]   ;;  %s498_s4 = inlined_call_operand.vmem [shape: f32[1,128], index: 4, kind: input, shape index: {}]   ;;  %s499_s5 = inlined_call_operand.vmem [shape: bf16[128,2], index: 5, kind: input, shape index: {}]   ;;  %s500_s6 = inlined_call_operand.vmem [shape: f32[1,2], index: 6, kind: input, shape index: {}]   ;;  %s501_s7 = inlined_call_operand.vmem [shape: f32[8,2], index: 7, kind: output, shape index: {0}]   ;;  %s502_s8 = inlined_call_operand.vmem [shape: s32[8,1], index: 8, kind: output, shape index: {1}]  }
   0x1   :  { %s21_s29 = sshll.u32 %s494_s0, 4  ;;  %s22_s29 = int_to_ptr.hbm [resolvable:$true] %s21_s29 }
   0x2   :  { %15 = vsyncpa [#allocation5], 0  ;;  %s373_s30 = smov [#allocation2]   ;;  %s31_s12 = sshll.u32 %s495_s1, 4  ;;  %s32_s12 = int_to_ptr.hbm [resolvable:$true] %s31_s12 }
   0x3   :  { %s23_s9 = sshll.u32 %s373_s30, 4  ;;  %s374_s13 = smov [#allocation4]   ;;  %s24_s9 = int_to_ptr.vmem [resolvable:$true] %s23_s9 }
   0x4   :  { %26 = dma.hbm_to_vmem [thread:$0]  %s22_s29, 128, %s24_s9, [#allocation3]  }
   0x5   :  { %s33_s14 = sshll.u32 %s374_s13, 4  ;;  %s375_s15 = smov 64   ;;  %s34_s14 = int_to_ptr.vmem [resolvable:$true] %s33_s14 }
   0x6   :  { %s376_s16 = smov 4  }
   0x7   :  { %39 = dma.hbm_to_vmem [thread:$0]  %s32_s12, 128, %s34_s14, [#allocation5], %s375_s15, %s375_s15, %s376_s16  }
   0x8   :  { %369 = dma.done.wait [#allocation3], 128  }
   0x9   :  { %370 = vsyncadd [#allocation3], 4294967168 }
   0xa   :  { %371 = dma.done.wait [#allocation5], 128  }
   0xb   :  { %372 = vsyncadd [#allocation5], 4294967168  ;;  %v60_v0 = vld [vmem:[#allocation4 + $0x4] sm:$0x1]  ;;  %vm71_vm0 = vcmask 1040384   ;;  %v303_v4 = vld [vmem:[%s497_s3 + $0x38] sm:$0xff]  }
   0xc   :  { %v59_v1 = vld [vmem:[#allocation4] sm:$0xf]  ;;  %v62_v2 = vunpack.c.l.bf16 %v60_v0  ;;  %v302_v5 = vld [vmem:[%s497_s3 + $0x30] sm:$0xff]   ;;  %v264_v6 = vunpack.c.h.bf16 %v303_v4  ;;  %v263_v7 = vunpack.c.l.bf16 %v303_v4  ;;  %v58_v8 = vld [vmem:[#allocation2] sm:$0xff]  ;;  %vm67_vm1 = vcmask 72704   ;;  %s377_s28 = smov 1  }
   0xd   :  { %v61_v3 = vunpack.c.l.bf16 %v59_v1  ;;  %v260_v9 = vunpack.c.h.bf16 %v302_v5  ;;  %v301_v10 = vld [vmem:[%s497_s3 + $0x28] sm:$0xff]   ;;  %v259_v11 = vunpack.c.l.bf16 %v302_v5  ;;  %v300_v13 = vld [vmem:[%s497_s3 + $0x20] sm:$0xff]   ;;  %v299_v16 = vld [vmem:[%s497_s3 + $0x18] sm:$0xff]   ;;  %vm209_vm2 = vcmask 15360  }
   0xe   :  { %231 = vmatpush.msk.msra.mxu0 %vm71_vm0, %v62_v2  ;;  %132 = vmatpush.msra.mxu1 %v264_v6  ;;  %v256_v12 = vunpack.c.h.bf16 %v301_v10  ;;  %v255_v14 = vunpack.c.l.bf16 %v301_v10  ;;  %v252_v15 = vunpack.c.h.bf16 %v300_v13  ;;  %v251_v17 = vunpack.c.l.bf16 %v300_v13  ;;  %v298_v19 = vld [vmem:[%s497_s3 + $0x10] sm:$0xff]   ;;  %v297_v22 = vld [vmem:[%s497_s3 + $0x8] sm:$0xff]   ;;  %v234_v26 = vld [vmem:[%s497_s3] sm:$0xff]  }
   0xf   :  { %v248_v18 = vunpack.c.h.bf16 %v299_v16  ;;  %v247_v20 = vunpack.c.l.bf16 %v299_v16  ;;  %v244_v21 = vunpack.c.h.bf16 %v298_v19  ;;  %v243_v23 = vunpack.c.l.bf16 %v298_v19  ;;  %v310_v29 = vld [vmem:[%s499_s5 + $0x38] sm:$0xff]   ;;  %v309_v30 = vld [vmem:[%s499_s5 + $0x30] sm:$0xff]   ;;  %v308_v34 = vld [vmem:[%s499_s5 + $0x28] sm:$0xff]  }
  0x10   :  { %90 = vmatpush.msra.mxu0 %v61_v3  ;;  %133 = vmatpush.msra.mxu1 %v263_v7  ;;  %v240_v24 = vunpack.c.h.bf16 %v297_v22  ;;  %v239_v25 = vunpack.c.l.bf16 %v297_v22  ;;  %v236_v27 = vunpack.c.h.bf16 %v234_v26  ;;  %v235_v28 = vunpack.c.l.bf16 %v234_v26  ;;  %v307_v37 = vld [vmem:[%s499_s5 + $0x20] sm:$0xff]   ;;  %v306_v40 = vld [vmem:[%s499_s5 + $0x18] sm:$0xff]   ;;  %v305_v43 = vld [vmem:[%s499_s5 + $0x10] sm:$0xff]  }
  0x11   :  { %232 = vmatmul.msk.f32.vlgmr.msra.gmra.mxu0 %vm67_vm1, %v58_v8  ;;  %v296_v31 = vunpack.c.h.bf16 %v310_v29  ;;  %v295_v32 = vunpack.c.l.bf16 %v310_v29  ;;  %v292_v33 = vunpack.c.h.bf16 %v309_v30  ;;  %v291_v35 = vunpack.c.l.bf16 %v309_v30  ;;  %v304_v46 = vld [vmem:[%s499_s5 + $0x8] sm:$0xff]   ;;  %v318_v49 = vld [vmem:[%s496_s2] ss:$0 sm:$0xff] }
  0x12   :  { %134 = vmatpush.msra.mxu1 %v260_v9  ;;  %v288_v36 = vunpack.c.h.bf16 %v308_v34  ;;  %v287_v38 = vunpack.c.l.bf16 %v308_v34  ;;  %v284_v39 = vunpack.c.h.bf16 %v307_v37  ;;  %v283_v41 = vunpack.c.l.bf16 %v307_v37  ;;  %v266_v54 = vld [vmem:[%s499_s5] sm:$0xff]  }
  0x13   :  { %189 = vmatpush.msra.mxu2 %v296_v31  ;;  %v280_v42 = vunpack.c.h.bf16 %v306_v40  ;;  %v279_v44 = vunpack.c.l.bf16 %v306_v40  ;;  %v276_v45 = vunpack.c.h.bf16 %v305_v43  ;;  %v275_v47 = vunpack.c.l.bf16 %v305_v43  ;;  %v319_v57 = vld [vmem:[%s498_s4] ss:$0 sm:$0xff]  ;;  %s379_s4 = smov 127  }
  0x14   :  { %135 = vmatpush.msra.mxu1 %v259_v11  ;;  %v272_v48 = vunpack.c.h.bf16 %v304_v46  ;;  %v271_v53 = vunpack.c.l.bf16 %v304_v46  ;;  %v268_v55 = vunpack.c.h.bf16 %v266_v54  ;;  %v267_v56 = vunpack.c.l.bf16 %v266_v54  ;;  %v320_v61 = vld [vmem:[%s500_s6] ss:$0 sm:$0xff] }
  0x15   :  { %190 = vmatpush.msra.mxu2 %v295_v32  ;;  %v378_v1 = vmov 0   ;;  %vm219_vm4 = vcmask 7168  }
  0x16   :  { %136 = vmatpush.msra.mxu1 %v256_v12 }
  0x17   :  { %191 = vmatpush.msra.mxu2 %v292_v33 }
  0x18   :  { %137 = vmatpush.msra.mxu1 %v255_v14 }
  0x19   :  { %192 = vmatpush.msra.mxu2 %v291_v35 }
  0x1a   :  { %138 = vmatpush.msra.mxu1 %v252_v15 }
  0x1b   :  { %193 = vmatpush.msra.mxu2 %v288_v36 }
  0x1c   :  { %139 = vmatpush.msra.mxu1 %v251_v17 }
  0x1d   :  { %194 = vmatpush.msra.mxu2 %v287_v38 }
  0x1e   :  { %140 = vmatpush.msra.mxu1 %v248_v18 }
  0x1f   :  { %195 = vmatpush.msra.mxu2 %v284_v39 }
  0x20   :  { %141 = vmatpush.msra.mxu1 %v247_v20 }
  0x21   :  { %196 = vmatpush.msra.mxu2 %v283_v41 }
  0x22   :  { %142 = vmatpush.msra.mxu1 %v244_v21 }
  0x23   :  { %197 = vmatpush.msra.mxu2 %v280_v42 }
  0x24   :  { %143 = vmatpush.msra.mxu1 %v243_v23 }
  0x25   :  { %198 = vmatpush.msra.mxu2 %v279_v44 }
  0x26   :  { %144 = vmatpush.msra.mxu1 %v240_v24 }
  0x27   :  { %199 = vmatpush.msra.mxu2 %v276_v45 }
  0x28   :  { %145 = vmatpush.msra.mxu1 %v239_v25 }
  0x29   :  { %200 = vmatpush.msra.mxu2 %v275_v47 }
  0x2a   :  { %146 = vmatpush.msra.mxu1 %v236_v27 }
  0x2b   :  { %201 = vmatpush.msra.mxu2 %v272_v48 }
  0x2c   :  { %147 = vmatpush.msra.mxu1 %v235_v28 }
  0x2d   :  { %202 = vmatpush.msra.mxu2 %v271_v53 }
  0x2f   :  { %203 = vmatpush.msra.mxu2 %v268_v55 }
  0x31   :  { %204 = vmatpush.msra.mxu2 %v267_v56 }
  0x8e   :  { %v92_v50 = vpop.f32.mrf.mxu0 }
  0x8f   :  { %v93_v51 = vadd.f32 %v318_v49, %v92_v50 }
  0x91   :  { %v95_v52 = vmax.f32 %v93_v51, 0.0 }
  0x93   :  { %148 = vmatmul.f32.vlgmr.msra.gmra.mxu1 %v95_v52 }
 0x110   :  { %v149_v58 = vpop.f32.mrf.mxu1 }
 0x111   :  { %v150_v59 = vadd.f32 %v319_v57, %v149_v58 }
 0x113   :  { %v152_v60 = vmax.f32 %v150_v59, 0.0 }
 0x115   :  { %205 = vmatmul.f32.vlgmr.msra.gmra.mxu2 %v152_v60 }
 0x198   :  { %v206_v62 = vpop.f32.mrf.mxu2 }
 0x199   :  { %v207_v63 = vadd.f32 %v320_v61, %v206_v62 }
 0x19b   :  { %210 = vst.msk [vmem:[%s501_s7] sm:$0xff] %vm209_vm2, %v207_v63  ;;  %212 = vrot.lane.b32.xlu0 %v207_v63, %s377_s28 }
 0x20d   :  { %v213_v0 = vpop.permute.xlu0 %212 }
 0x20e   :  { %vm215_vm3 = vcmp.gt.f32.partialorder %v207_v63, %v213_v0 }
 0x20f   :  { %v216_v2 = vsel %vm215_vm3, 1, %v378_v1 }
 0x210   :  { %217 = vrot.lane.b32.xlu0 %v216_v2, %s379_s4 }
 0x282   :  { %v218_v3 = vpop.permute.xlu0 %217 }
 0x283   :  { %220 = vst.msk [vmem:[%s502_s8] sm:$0xff] %vm219_vm4, %v218_v3 }
 0x284   :  { %229 = vsyncpa [#allocation3], 1 }
 0x285   :  { %230 = vsyncpa [#allocation5], 1 }

</bundles_post_ra>
